<compile_context>
chip_gen: v6e
topology: v6e:2x2x1
jax: 0.10.0
libtpu: 0.0.40
codegen_flags: <defaults>
</compile_context>

<pallas_src>
import functools

import jax
import jax.numpy as jnp
import numpy as np
from jax.experimental import pallas as pl
from jax.experimental.pallas import tpu as pltpu

payoff_values = np.asarray(
    [[[[10, 0, 0], [4, 8, 4], [10, 0, 0]], [[0, 0, 10], [4, 8, 4], [0, 0, 10]]],
     [[[0, 0, 10], [4, 8, 4], [0, 0, 0]], [[10, 0, 0], [4, 8, 4], [10, 0, 0]]]],
    dtype=np.float32)

NUM_CARDS = payoff_values.shape[0]          # 2
IN_FEATURES = 2 * NUM_CARDS                 # 4
NUM_HIDDEN = 32
OUT_FEATURES = 1

MAX_TB = 4096                               # lane-tile for the batch axis


def _round_up(x: int, m: int) -> int:
    return ((x + m - 1) // m) * m


def mlp_kernel(x_ref, w1t_ref, b1_ref, w2_ref, b2_ref, o_ref):
    """x_ref: [4, TB], w1t_ref: [32, 4], b1_ref/w2_ref: [32, 1], b2_ref: [1, 1],
    o_ref: [1, TB] (batch on lanes -> lane-dense stores)."""
    x = x_ref[...]                                               # [4, TB]
    # First linear on the MXU (K=4 is tiny; this kernel is HBM/DMA-bound anyway).
    h = jnp.dot(w1t_ref[...], x, preferred_element_type=jnp.float32)   # [32, TB]
    h = jnp.maximum(h + b1_ref[...], 0.0)                        # bias + ReLU (VPU)
    # Second linear (hidden -> 1) as a VPU multiply + 32-way sublane reduce
    # instead of an N=1 MXU matmul.
    y = jnp.sum(h * w2_ref[...], axis=0, keepdims=True)          # [1, TB]
    o_ref[...] = y + b2_ref[...]


@jax.jit
def baseline_0_mlp(x, w1, b1, w2, b2):
    """x: [B, 4] f32 -> [B, 1] f32.  w1: [4, 32], b1: [1, 32], w2: [32, 1], b2: [1, 1]."""
    B = x.shape[0]
    tb = min(MAX_TB, _round_up(B, 128))
    b_pad = _round_up(B, tb)

    # Batch-on-lanes layout, zero-padded to a multiple of the lane tile.
    xt = jnp.zeros((IN_FEATURES, b_pad), jnp.float32).at[:, :B].set(x.T)
    w1t = w1.T.astype(jnp.float32)                               # [32, 4]
    b1c = b1.reshape(NUM_HIDDEN, 1).astype(jnp.float32)          # [32, 1]
    w2c = w2.reshape(NUM_HIDDEN, 1).astype(jnp.float32)          # [32, 1]
    b2c = b2.reshape(1, 1).astype(jnp.float32)                   # [1, 1]

    out = pl.pallas_call(
        mlp_kernel,
        out_shape=jax.ShapeDtypeStruct((1, b_pad), jnp.float32),
        grid=(b_pad // tb,),
        in_specs=[
            pl.BlockSpec((IN_FEATURES, tb), lambda i: (0, i)),         # x tile, pipelined
            pl.BlockSpec((NUM_HIDDEN, IN_FEATURES), lambda i: (0, 0)),  # w1^T, resident
            pl.BlockSpec((NUM_HIDDEN, 1), lambda i: (0, 0)),            # b1, resident
            pl.BlockSpec((NUM_HIDDEN, 1), lambda i: (0, 0)),            # w2, resident
            pl.BlockSpec((1, 1), lambda i: (0, 0)),                     # b2, resident
        ],
        out_specs=pl.BlockSpec((1, tb), lambda i: (0, i)),              # lane-dense output
        compiler_params=pltpu.CompilerParams(
            dimension_semantics=("parallel",)),
    )(xt, w1t, b1c, w2c, b2c)

    return out[:, :B].T                                          # [B, 1]


def init_params(key):
    # Deterministic init mimicking PyTorch's Linear default: U(-1/sqrt(fan_in), 1/sqrt(fan_in)).
    k1, k2, k3, k4 = jax.random.split(key, 4)
    bound1 = 1.0 / np.sqrt(IN_FEATURES)
    bound2 = 1.0 / np.sqrt(NUM_HIDDEN)
    w1 = jax.random.uniform(k1, (IN_FEATURES, NUM_HIDDEN), jnp.float32, -bound1, bound1)
    b1 = jax.random.uniform(k2, (1, NUM_HIDDEN), jnp.float32, -bound1, bound1)
    w2 = jax.random.uniform(k3, (NUM_HIDDEN, OUT_FEATURES), jnp.float32, -bound2, bound2)
    b2 = jax.random.uniform(k4, (1, OUT_FEATURES), jnp.float32, -bound2, bound2)
    return w1, b1, w2, b2


if __name__ == "__main__":
    key = jax.random.PRNGKey(0)
    kx, kp = jax.random.split(key)

    batch = 8
    x = jax.random.normal(kx, (batch, IN_FEATURES), jnp.float32)
    w1, b1, w2, b2 = init_params(kp)

    out = baseline_0_mlp(x, w1, b1, w2, b2)
    out = jax.block_until_ready(out)

    # Reference check in plain JAX (same math as the PyTorch module).
    ref = jnp.maximum(x @ w1 + b1, 0.0) @ w2 + b2
    np.testing.assert_allclose(np.asarray(out), np.asarray(ref), rtol=1e-5, atol=1e-5)
    assert out.shape == (batch, 1)

    # Also exercise a batch larger than one tile to check the grid path.
    big = 9000
    xb = jax.random.normal(kx, (big, IN_FEATURES), jnp.float32)
    outb = jax.block_until_ready(baseline_0_mlp(xb, w1, b1, w2, b2))
    refb = jnp.maximum(xb @ w1 + b1, 0.0) @ w2 + b2
    np.testing.assert_allclose(np.asarray(outb), np.asarray(refb), rtol=1e-5, atol=1e-5)
    assert outb.shape == (big, 1)

    print("KERNEL_OK")
</pallas_src>

<mosaic_0001>
module attributes {stable_mosaic.version = 11 : i64} {
  func.func @mlp_kernel(%arg0: i32, %arg1: memref<4x128xf32, #tpu.memory_space<vmem>>, %arg2: memref<32x4xf32, #tpu.memory_space<vmem>>, %arg3: memref<32x1xf32, #tpu.memory_space<vmem>>, %arg4: memref<32x1xf32, #tpu.memory_space<vmem>>, %arg5: memref<1x1xf32, #tpu.memory_space<vmem>>, %arg6: memref<1x128xf32, #tpu.memory_space<vmem>>) attributes {dimension_semantics = [#tpu.dimension_semantics<parallel>], iteration_bounds = array<i64: 1>, scalar_prefetch = 0 : i64, scratch_operands = 0 : i64, tpu.core_type = #tpu.core_type<tc>, window_params = [{transform_indices = @transform_0, window_bounds = array<i64: 4, 128>}, {pipeline_mode = #tpu.pipeline_mode<synchronous>, transform_indices = @transform_1, window_bounds = array<i64: 32, 4>}, {pipeline_mode = #tpu.pipeline_mode<synchronous>, transform_indices = @transform_2, window_bounds = array<i64: 32, 1>}, {pipeline_mode = #tpu.pipeline_mode<synchronous>, transform_indices = @transform_3, window_bounds = array<i64: 32, 1>}, {pipeline_mode = #tpu.pipeline_mode<synchronous>, transform_indices = @transform_4, window_bounds = array<i64: 1, 1>}, {transform_indices = @transform_5, window_bounds = array<i64: 1, 128>}]} {
    %c0 = arith.constant 0 : index
    %c0_0 = arith.constant 0 : index
    %0 = vector.load %arg1[%c0, %c0_0] : memref<4x128xf32, #tpu.memory_space<vmem>>, vector<4x128xf32>
    %c0_1 = arith.constant 0 : index
    %c0_2 = arith.constant 0 : index
    %1 = vector.load %arg2[%c0_1, %c0_2] : memref<32x4xf32, #tpu.memory_space<vmem>>, vector<32x4xf32>
    %cst = arith.constant dense<0.000000e+00> : vector<32x128xf32>
    %2 = tpu.matmul %1, %0, %cst {dimension_numbers = #tpu.dot_dimension_numbers<[1], [0], [0], [1], [0, 0, 1, 1], [], []>} : vector<32x4xf32>, vector<4x128xf32>, vector<32x128xf32> -> vector<32x128xf32>
    %c0_3 = arith.constant 0 : index
    %c0_4 = arith.constant 0 : index
    %3 = vector.load %arg3[%c0_3, %c0_4] : memref<32x1xf32, #tpu.memory_space<vmem>>, vector<32x1xf32>
    %4 = vector.broadcast %3 : vector<32x1xf32> to vector<32x128xf32>
    %5 = arith.addf %2, %4 : vector<32x128xf32>
    %cst_5 = arith.constant 0.000000e+00 : f32
    %6 = vector.broadcast %cst_5 : f32 to vector<32x128xf32>
    %7 = arith.maximumf %5, %6 : vector<32x128xf32>
    %c0_6 = arith.constant 0 : index
    %c0_7 = arith.constant 0 : index
    %8 = vector.load %arg4[%c0_6, %c0_7] : memref<32x1xf32, #tpu.memory_space<vmem>>, vector<32x1xf32>
    %9 = vector.broadcast %8 : vector<32x1xf32> to vector<32x128xf32>
    %10 = arith.mulf %7, %9 : vector<32x128xf32>
    %cst_8 = arith.constant dense<0.000000e+00> : vector<128xf32>
    %11 = vector.multi_reduction <add>, %10, %cst_8 [0] : vector<32x128xf32> to vector<128xf32>
    %12 = vector.shape_cast %11 : vector<128xf32> to vector<1x128xf32>
    %c0_9 = arith.constant 0 : index
    %c0_10 = arith.constant 0 : index
    %13 = vector.load %arg5[%c0_9, %c0_10] : memref<1x1xf32, #tpu.memory_space<vmem>>, vector<1x1xf32>
    %14 = vector.broadcast %13 : vector<1x1xf32> to vector<1x128xf32>
    %15 = arith.addf %12, %14 : vector<1x128xf32>
    %c0_11 = arith.constant 0 : index
    %c0_12 = arith.constant 0 : index
    %16 = vector.load %arg6[%c0_11, %c0_12] : memref<1x128xf32, #tpu.memory_space<vmem>>, vector<1x128xf32>
    tpu.vector_store %arg6[%c0_11, %c0_12], %15 {strides = array<i32>} : memref<1x128xf32, #tpu.memory_space<vmem>>, vector<1x128xf32>,
    return
  }
  func.func @transform_0(%arg0: i32) -> (i32, i32) {
    %c0_i32 = arith.constant 0 : i32
    %c0_i32_0 = arith.constant 0 : i32
    return %c0_i32, %arg0 : i32, i32
  }
  func.func @transform_1(%arg0: i32) -> (i32, i32) {
    %c0_i32 = arith.constant 0 : i32
    %c0_i32_0 = arith.constant 0 : i32
    %c0_i32_1 = arith.constant 0 : i32
    return %c0_i32, %c0_i32_0 : i32, i32
  }
  func.func @transform_2(%arg0: i32) -> (i32, i32) {
    %c0_i32 = arith.constant 0 : i32
    %c0_i32_0 = arith.constant 0 : i32
    %c0_i32_1 = arith.constant 0 : i32
    return %c0_i32, %c0_i32_0 : i32, i32
  }
  func.func @transform_3(%arg0: i32) -> (i32, i32) {
    %c0_i32 = arith.constant 0 : i32
    %c0_i32_0 = arith.constant 0 : i32
    %c0_i32_1 = arith.constant 0 : i32
    return %c0_i32, %c0_i32_0 : i32, i32
  }
  func.func @transform_4(%arg0: i32) -> (i32, i32) {
    %c0_i32 = arith.constant 0 : i32
    %c0_i32_0 = arith.constant 0 : i32
    %c0_i32_1 = arith.constant 0 : i32
    return %c0_i32, %c0_i32_0 : i32, i32
  }
  func.func @transform_5(%arg0: i32) -> (i32, i32) {
    %c0_i32 = arith.constant 0 : i32
    %c0_i32_0 = arith.constant 0 : i32
    return %c0_i32, %arg0 : i32, i32
  }
}

</mosaic_0001>

<bundles_post_ra>
// kernel: baseline_0_mlp.1
= control target key start
LH: loop header
LB: loop body
LE: loop exit
PB: predicated region body
PF: predicated region fallthrough
CT: control target
= control target key end

     0   :  { %vm64_vm0 = vcmask 1043456   ;;  %vm51_vm1 = vcmask 31744   ;;  %v233_v3 = vmov 0   ;;  %v200_v42 = vlaneseq  ;;  %s317_s0 = inlined_call_operand.vmem [shape: f32[4,128], index: 0, kind: input, shape index: {}]   ;;  %s318_s1 = inlined_call_operand.vmem [shape: f32[32,4], index: 1, kind: input, shape index: {}]   ;;  %s319_s2 = inlined_call_operand.vmem [shape: f32[32,1], index: 2, kind: input, shape index: {}]   ;;  %s320_s4 = inlined_call_operand.<no memory space> [shape: f32[1,1], index: 4, kind: input, shape index: {}]   ;;  %s321_s3 = inlined_call_operand.vmem [shape: f32[32,1], index: 3, kind: input, shape index: {}]   ;;  %s322_s5 = inlined_call_operand.vmem [shape: f32[1,128], index: 5, kind: output, shape index: {}]  }
   0x1   :  { %v22_v0 = vld [vmem:[%s317_s0] sm:$0xf]  ;;  %v25_v2 = vld [vmem:[%s318_s1 + $0x10] sm:$0xff]  ;;  %231 = vset.pattern.permute.xlu0 %v233_v3  ;;  %232 = vset.pattern.permute.xlu1 %v233_v3  ;;  %v10_v4 = vstv %s320_s4  ;;  %v24_v5 = vld [vmem:[%s318_s1 + $0x8] sm:$0xff] }
   0x2   :  { %v23_v1 = vld [vmem:[%s318_s1] sm:$0xff]  ;;  %220 = vmatprep.subr.msk.mxu0 %vm64_vm0, %v22_v0  ;;  %228 = vmatprep.subr.msk.mxu1 %vm64_vm0, %v22_v0  ;;  %v26_v6 = vld [vmem:[%s318_s1 + $0x18] sm:$0xff]  ;;  %11 = vst [vmem:[#allocation2] sm:$0x1] %v10_v4  ;;  %v29_v8 = vld [vmem:[%s319_s2 + $0x10] sm:$0xff]  ;;  %v201_v45 = vshrl.u32 %v200_v42, 7 }
   0x3   :  { %221 = vmatpush3.msk.msra.mxu0 %vm64_vm0, %v22_v0  ;;  %229 = vmatpush3.msk.msra.mxu1 %vm64_vm0, %v22_v0  ;;  %v27_v7 = vld [vmem:[%s319_s2] sm:$0xff]  ;;  %v28_v9 = vld [vmem:[%s319_s2 + $0x8] sm:$0xff]  ;;  %v30_v10 = vld [vmem:[%s319_s2 + $0x18] sm:$0xff] }
   0x4   :  { %222 = vmatprep.mubr.msk.f32.mxu0 %vm51_vm1, %v23_v1  ;;  %225 = vmatprep.mubr.msk.f32.mxu1 %vm51_vm1, %v25_v2  ;;  %v157_v11 = vld [vmem:[%s321_s3] sm:$0xff]  ;;  %v158_v12 = vld [vmem:[%s321_s3 + $0x8] sm:$0xff]  ;;  %v159_v13 = vld [vmem:[%s321_s3 + $0x10] sm:$0xff]  ;;  %v202_v48 = vsub.s32 0, %v201_v45 }
   0x5   :  { %223 = vmatmul.mubr.msk.f32.vlgmr.msra.gmra.mxu0 %vm51_vm1, %v24_v5  ;;  %226 = vmatmul.mubr.msk.f32.vlgmr.msra.gmra.mxu1 %vm51_vm1, %v26_v6  ;;  %v160_v14 = vld [vmem:[%s321_s3 + $0x18] sm:$0xff] }
   0x6   :  { %33 = vperm.xlu0 %231, %v27_v7   ;;  %43 = vperm.xlu1 %232, %v29_v8  }
   0x9   :  { %v194_v15 = vld [vmem:[#allocation2] sm:$0x1] }
   0xa   :  { %38 = vperm.xlu0 %231, %v28_v9   ;;  %48 = vperm.xlu1 %232, %v30_v10  }
   0xe   :  { %163 = vperm.xlu0 %231, %v157_v11   ;;  %168 = vperm.xlu1 %232, %v158_v12  }
  0x12   :  { %173 = vperm.xlu0 %231, %v159_v13   ;;  %178 = vperm.xlu1 %232, %v160_v14  }
  0x16   :  { %197 = vperm.xlu0 %231, %v194_v15  }
  0x81   :  { %v34_v16 = vpop.permute.xlu0 %33  ;;  %v44_v17 = vpop.permute.xlu1 %43 }
  0x85   :  { %v39_v18 = vpop.permute.xlu0 %38  ;;  %v49_v19 = vpop.permute.xlu1 %48 }
  0x89   :  { %v164_v22 = vpop.permute.xlu0 %163  ;;  %v169_v30 = vpop.permute.xlu1 %168 }
  0x8d   :  { %v174_v36 = vpop.permute.xlu0 %173  ;;  %v179_v39 = vpop.permute.xlu1 %178 }
  0x91   :  { %v198_v50 = vpop.permute.xlu0 %197 }
  0x92   :  { %v203_v52 = vrot.slane %v198_v50, %v202_v48 }
  0xc5   :  { %v224_v20 = vpop.f32.mrf.mxu0  ;;  %v227_v21 = vpop.f32.mrf.mxu1 }
  0xc6   :  { %v140_v23 = vadd.f32 %v224_v20, %v39_v18  ;;  %v150_v27 = vadd.f32 %v227_v21, %v49_v19 }
  0xc7   :  { %v134_v24 = vpop.f32.mrf.mxu0  ;;  %v144_v25 = vpop.f32.mrf.mxu1 }
  0xc8   :  { %v154_v26 = vmax.f32 %v140_v23, 0.0  ;;  %v135_v28 = vadd.f32 %v134_v24, %v34_v16  ;;  %v145_v29 = vadd.f32 %v144_v25, %v44_v17  ;;  %v156_v34 = vmax.f32 %v150_v27, 0.0 }
  0xca   :  { %v153_v31 = vmax.f32 %v135_v28, 0.0  ;;  %v155_v32 = vmax.f32 %v145_v29, 0.0  ;;  %v182_v33 = vmul.f32 %v169_v30, %v154_v26  ;;  %v184_v40 = vmul.f32 %v179_v39, %v156_v34 }
  0xcc   :  { %v181_v35 = vmul.f32 %v164_v22, %v153_v31  ;;  %v183_v38 = vmul.f32 %v174_v36, %v155_v32 }
  0xce   :  { %v185_v37 = vadd.f32 %v182_v33, %v181_v35 }
  0xd0   :  { %v186_v41 = vadd.f32 %v185_v37, %v183_v38 }
  0xd2   :  { %v187_v43 = vadd.f32 %v186_v41, %v184_v40 }
  0xd4   :  { %v188_v44 = vrot.slane %v187_v43, 4 }
  0xd6   :  { %v189_v46 = vadd.f32 %v188_v44, %v187_v43 }
  0xd8   :  { %v190_v47 = vrot.slane %v189_v46, 2 }
  0xda   :  { %v191_v49 = vadd.f32 %v190_v47, %v189_v46 }
  0xdc   :  { %v192_v51 = vrot.slane %v191_v49, 1 }
  0xde   :  { %v193_v53 = vadd.f32 %v192_v51, %v191_v49 }
  0xe0   :  { %v204_v54 = vadd.f32 %v203_v52, %v193_v53 }
  0xe2   :  { %205 = vst [vmem:[%s322_s5] sm:$0x1] %v204_v54 }

</bundles_post_ra>
